<compile_context>
chip_gen: v7x
topology: tpu7x:2x2x1
jax: 0.10.0
libtpu: 0.0.40
codegen_flags: <defaults>
</compile_context>

<pallas_src>
import jax
import jax.numpy as jnp
from jax.experimental import pallas as pl
from jax.experimental.pallas import tpu as pltpu


def _copy_kernel(x_ref, o_ref):
    # Straight lane-dense copy of one (TM, TN) tile.
    o_ref[...] = x_ref[...]


_LANE = 128
_LANE_CAP = 16384  # max lane-tile width (multiple of 128)


def _sublane_pack(itemsize):
    """Native sublane packing: 8 for f32, 16 for bf16/f16, 32 for int8/fp8."""
    return 8 * max(1, 4 // itemsize)


def _per_buffer_budget_bytes():
    """Per-VMEM-buffer byte target: 4 live buffers (2 in + 2 out) must stay
    under the default scoped-VMEM limit (16 MiB on v5e, 32 MiB on v6e/v7x)."""
    try:
        kind = jax.devices()[0].device_kind.lower()
    except Exception:
        kind = ""
    if "v6" in kind or "v7" in kind or "7x" in kind:
        return 6 * 1024 * 1024   # 4 x 6 MiB = 24 MiB < 32 MiB scoped default
    return 3 * 1024 * 1024       # v5e / unknown: 4 x 3 MiB = 12 MiB < 16 MiB


def _largest_aligned_divisor(value, align, cap):
    """Largest d <= cap with d % align == 0 and value % d == 0.
    Requires value % align == 0 (guaranteed by the caller)."""
    d = min(cap, value)
    d -= d % align
    while value % d:
        d -= align
    return d


def flatten(x, *, donate_input=False):
    """Pallas equivalent of Flatten.forward: (N, ...) -> (N, prod(...))."""
    n = x.shape[0]
    flat = 1
    for d in x.shape[1:]:
        flat *= d

    # Degenerate shapes: the (free) reshape is the whole op.
    if n == 0 or flat == 0:
        return x.reshape(n, flat)

    itemsize = jnp.dtype(x.dtype).itemsize
    sub = _sublane_pack(itemsize)
    budget = _per_buffer_budget_bytes()
    total = n * flat

    if total % (sub * _LANE) == 0:
        # ---- Lane/sublane-dense slab path ----
        # The kernel is a pure byte copy, so the 2-D shape is arbitrary.
        # Pick L | (total // sub) so rows = total // L is a multiple of `sub`:
        # every tile is made of full vregs -> unmasked vld/vst.
        lane = _largest_aligned_divisor(total // sub, _LANE, _LANE_CAP)
        rows = total // lane                      # multiple of `sub`
        tn = lane
        tm = max(sub, (budget // (lane * itemsize)) // sub * sub)
        tm = min(tm, rows)
        # Keep >= 8 grid steps when there is enough data so v7x's two
        # TensorCores both get work and DMA-in/out stays overlapped.
        if rows >= 8 * sub:
            tm = min(tm, max(sub, (rows // 8) // sub * sub))
        work_shape = (rows, lane)
    else:
        # ---- Non-aligned fallback: tile the raw (N, FLAT) view ----
        # Fixed aligned tiles + cdiv partial last blocks (never "block = whole
        # dimension", which could blow scoped VMEM for large unaligned FLAT).
        work_shape = (n, flat)
        if flat >= _LANE:
            tn = min((flat // _LANE) * _LANE, 8192)   # multiple of 128
        else:
            tn = flat                                 # full-dim block is legal
        if n >= sub:
            tm = max(sub, (budget // (tn * itemsize)) // sub * sub)
            tm = min(tm, (n // sub) * sub)            # multiple of `sub`, <= n
        else:
            tm = n                                    # full-dim block is legal

    # Metadata-only, row-major view: identical semantics to torch .view() on a
    # contiguous tensor.  The kernel only ever sees the lane-dense 2-D layout.
    x2 = x.reshape(work_shape)
    grid = (pl.cdiv(work_shape[0], tm), pl.cdiv(work_shape[1], tn))

    bytes_accessed = 2 * total * itemsize  # read + write

    out2 = pl.pallas_call(
        _copy_kernel,
        out_shape=jax.ShapeDtypeStruct(work_shape, x.dtype),
        grid=grid,
        in_specs=[pl.BlockSpec((tm, tn), lambda i, j: (i, j))],
        out_specs=pl.BlockSpec((tm, tn), lambda i, j: (i, j)),
        # Opt-in: identical shape + index maps, so the output can reuse the
        # input's HBM buffer (lower peak footprint).  Off by default because
        # the eager demo still reads `x` afterwards.
        input_output_aliases=({0: 0} if donate_input else {}),
        compiler_params=pltpu.CompilerParams(
            dimension_semantics=("parallel", "parallel")),
        cost_estimate=pl.CostEstimate(
            flops=0, transcendentals=0, bytes_accessed=bytes_accessed),
    )(x2)

    # Free view back to the (N, FLAT) result shape.
    return out2.reshape(n, flat)


if __name__ == "__main__":
    key = jax.random.PRNGKey(0)

    # batch=2, channels=4, spatial=16x16 -> flattened dim 1024 (slab path).
    x = jax.random.normal(key, (2, 4, 16, 16), dtype=jnp.float32)
    ref = x.reshape(x.shape[0], -1)  # == torch .view semantics
    out = jax.block_until_ready(flatten(x))
    assert out.shape == (2, 4 * 16 * 16), out.shape
    assert out.dtype == x.dtype
    assert bool(jnp.array_equal(out, ref)), "mismatch vs reference reshape"

    # Robustness check: small, non-(8x128)-aligned shape (fallback path,
    # full-dim blocks).
    y = jax.random.normal(jax.random.PRNGKey(1), (3, 5, 7), dtype=jnp.float32)
    out_y = jax.block_until_ready(flatten(y))
    assert bool(jnp.array_equal(out_y, y.reshape(3, -1))), "unaligned mismatch"

    # Robustness check: cdiv partial blocks on both axes (fallback path).
    z = jax.random.normal(jax.random.PRNGKey(2), (10, 300), dtype=jnp.float32)
    out_z = jax.block_until_ready(flatten(z))
    assert bool(jnp.array_equal(out_z, z.reshape(10, -1))), "partial-block mismatch"

    print("KERNEL_OK")
</pallas_src>

<mosaic_0001>
module attributes {stable_mosaic.version = 11 : i64} {
  func.func @_copy_kernel(%arg0: i32, %arg1: i32, %arg2: memref<8x256xf32, #tpu.memory_space<vmem>>, %arg3: memref<8x256xf32, #tpu.memory_space<vmem>>) attributes {dimension_semantics = [#tpu.dimension_semantics<parallel>, #tpu.dimension_semantics<parallel>], iteration_bounds = array<i64: 1, 1>, scalar_prefetch = 0 : i64, scratch_operands = 0 : i64, tpu.core_type = #tpu.core_type<tc>, window_params = [{transform_indices = @transform_0, window_bounds = array<i64: 8, 256>}, {transform_indices = @transform_1, window_bounds = array<i64: 8, 256>}]} {
    %c0 = arith.constant 0 : index
    %c0_0 = arith.constant 0 : index
    %0 = vector.load %arg2[%c0, %c0_0] : memref<8x256xf32, #tpu.memory_space<vmem>>, vector<8x256xf32>
    %c0_1 = arith.constant 0 : index
    %c0_2 = arith.constant 0 : index
    %1 = vector.load %arg3[%c0_1, %c0_2] : memref<8x256xf32, #tpu.memory_space<vmem>>, vector<8x256xf32>
    tpu.vector_store %arg3[%c0_1, %c0_2], %0 {strides = array<i32>} : memref<8x256xf32, #tpu.memory_space<vmem>>, vector<8x256xf32>,
    return
  }
  func.func @transform_0(%arg0: i32, %arg1: i32) -> (i32, i32) {
    %c0_i32 = arith.constant 0 : i32
    return %arg0, %arg1 : i32, i32
  }
  func.func @transform_1(%arg0: i32, %arg1: i32) -> (i32, i32) {
    %c0_i32 = arith.constant 0 : i32
    return %arg0, %arg1 : i32, i32
  }
}

</mosaic_0001>

<bundles_post_ra>
// kernel: tpu_custom_call.1
= control target key start
LH: loop header
LB: loop body
LE: loop exit
PB: predicated region body
PF: predicated region fallthrough
CT: control target
= control target key end

     0   :  { %6 = vsyncpa [#allocation3], 0  ;;  %s126_s0 = inlined_call_operand.hbm [shape: f32[8,256], index: 0, kind: input, shape index: {}]   ;;  %s127_s1 = inlined_call_operand.hbm [shape: f32[8,256], index: 1, kind: output, shape index: {}]  }
   0x1   :  { %7 = vsyncpa [#allocation4], 0  ;;  %s90_s6 = smov [#allocation2]   ;;  %s42_s10 = scalar_lea.hbm %s126_s0, 256 }
   0x2   :  { %s14_s7 = sshll.u32 %s90_s6, 4  ;;  %p43_p0 = scmp.ne.s32.totalorder %s126_s0, %s42_s10  ;;  %s15_s7 = int_to_ptr.vmem [resolvable:$true] %s14_s7 }
   0x3   :  { %p46_p1 = scmp.lt.u32.totalorder %s42_s10, %s126_s0 }
   0x5   :  { %p48_p2 = pnand %p46_p1, %p43_p0 }
   0x7   :  { %51 = shalt.err (!%p48_p2)
}
   0x8   :  { %s52_s15 = scalar_lea.vmem %s15_s7, 256  ;;  %p57_p4 = scmp.lt.s32.totalorder %s15_s7, %s15_s7 }
   0x9   :  { %p53_p3 = scmp.ne.s32.totalorder %s15_s7, %s52_s15  ;;  %p58_p5 = scmp.lt.s32.totalorder %s52_s15, %s52_s15 }
   0xb   :  { %p59_p6 = por %p58_p5, %p57_p4 }
   0xd   :  { %p60_p7 = pnand %p59_p6, %p53_p3 }
   0xf   :  { %63 = shalt.err (!%p60_p7)
}
  0x10   :  { %17 = dma.hbm_to_vmem [thread:$0]  %s126_s0, 256, %s15_s7, [#allocation3]  }
  0x11   :  { %86 = dma.done.wait [#allocation3], 256  }
  0x12   :  { %87 = vsyncadd [#allocation3], 4294967040  ;;  %s91_s18 = smov [#allocation5]   ;;  %v21_v0 = vld [vmem:[#allocation2] sm:$0xff]  ;;  %v22_v1 = vld [vmem:[#allocation2 + $0x8] sm:$0xff] }
  0x13   :  { %s31_s19 = sshll.u32 %s91_s18, 4  ;;  %23 = vst [vmem:[#allocation5] sm:$0xff] %v21_v0  ;;  %24 = vst [vmem:[#allocation5 + $0x8] sm:$0xff] %v22_v1  ;;  %s32_s19 = int_to_ptr.vmem [resolvable:$true] %s31_s19 }
  0x14   :  { %s64_s20 = scalar_lea.vmem %s32_s19, 256  ;;  %p69_p9 = scmp.lt.s32.totalorder %s32_s19, %s32_s19 }
  0x15   :  { %p65_p8 = scmp.ne.s32.totalorder %s32_s19, %s64_s20  ;;  %p70_p10 = scmp.lt.s32.totalorder %s64_s20, %s64_s20 }
  0x17   :  { %p71_p11 = por %p70_p10, %p69_p9 }
  0x19   :  { %p72_p12 = pnand %p71_p11, %p65_p8 }
  0x1b   :  { %75 = shalt.err (!%p72_p12)
}
  0x1c   :  { %s76_s0 = scalar_lea.hbm %s127_s1, 256 }
  0x1d   :  { %p77_p13 = scmp.ne.s32.totalorder %s127_s1, %s76_s0  ;;  %p80_p0 = scmp.lt.u32.totalorder %s76_s0, %s127_s1 }
  0x1f   :  { %p82_p1 = pnand %p80_p0, %p77_p13 }
  0x21   :  { %85 = shalt.err (!%p82_p1)
}
  0x22   :  { %34 = dma.vmem_to_hbm [thread:$0]  %s32_s19, 256, %s127_s1, [#allocation4]  }
  0x23   :  { %88 = dma.done.wait [#allocation4], 256  }
  0x24   :  { %89 = vsyncadd [#allocation4], 4294967040 }
  0x25   :  { %38 = vsyncpa [#allocation3], 1 }
  0x26   :  { %39 = vsyncpa [#allocation4], 1 }

</bundles_post_ra>
